<compile_context>
chip_gen: v6e
topology: v6e:2x2x1
jax: 0.10.0
libtpu: 0.0.40
codegen_flags: <defaults>
</compile_context>

<pallas_src>
import jax
import jax.numpy as jnp
from jax.experimental import pallas as pl
from jax.experimental.pallas import tpu as pltpu


_LANE = 128
_SUBLANE = 8
_MAX_TF = 4096                      # lanes per tile cap
_MAX_TB = 512                       # rows per tile cap
_TILE_BYTES_BUDGET = 4 << 20        # per x tile; in+out double-buffered => ~4x live
_VMEM_LIMIT_BYTES = 32 * 1024 * 1024


def _drop_path_kernel(x_ref, mask_ref, o_ref):
    # x_ref:    (TB, TF) tile of the flattened (B, F) input
    # mask_ref: (TB, 1) pre-scaled keep mask in x.dtype, resident across the
    #           F grid axis (its index_map only depends on the B grid coord)
    # o_ref:    (TB, TF) output tile
    o_ref[...] = x_ref[...] * mask_ref[...]


def _choose_tiles(B: int, F: int, itemsize: int):
    """Pick (TB, TF) block shape: multiples of (8, 128) or full extents."""
    # Lane (feature) tile: multiple of 128, or the full extent if F < 128.
    if F < _LANE:
        TF = F
    else:
        TF = min(_MAX_TF, (F // _LANE) * _LANE)

    # Row tile: multiple of 8 (or the full extent if B is not 8-aligned),
    # sized so one x tile stays within the per-tile VMEM budget.
    if B % _SUBLANE != 0:
        TB = B                                    # full extent is always legal
    else:
        rows_by_budget = max(_SUBLANE, _TILE_BYTES_BUDGET // max(1, TF * itemsize))
        TB = min(B, _MAX_TB, (rows_by_budget // _SUBLANE) * _SUBLANE)
        TB = max(TB, _SUBLANE)

    # Megacore (v7x has 2 TensorCores): make sure a medium/large tensor does
    # not land on a single-block grid, otherwise one core sits idle.
    if pl.cdiv(B, TB) * pl.cdiv(F, TF) < 2 and B * F * itemsize > (2 << 20):
        if TF % _LANE == 0 and TF >= 2 * _LANE:
            TF = ((TF // 2) // _LANE) * _LANE
        elif B % _SUBLANE == 0 and TB >= 2 * _SUBLANE:
            TB = ((TB // 2) // _SUBLANE) * _SUBLANE

    return TB, TF


def drop_path(x, key, drop_prob: float = 0.0, training: bool = False,
              scale_by_keep: bool = True, donate_input: bool = False):
    """JAX/Pallas equivalent of the reference `drop_path` function."""
    if drop_prob == 0.0 or not training:
        return x

    keep_prob = 1.0 - drop_prob
    B = x.shape[0]

    # Per-sample Bernoulli(keep_prob) mask, pre-scaled by 1/keep_prob
    # (matches x.new_empty(shape).bernoulli_(keep_prob).div_(keep_prob)),
    # cast to x.dtype so the kernel is a single broadcast multiply.
    inv_keep = (1.0 / keep_prob) if (keep_prob > 0.0 and scale_by_keep) else 1.0
    mask = jax.random.bernoulli(key, p=keep_prob, shape=(B,)).astype(jnp.float32)
    mask = (mask * jnp.float32(inv_keep)).astype(x.dtype).reshape(B, 1)

    orig_shape = x.shape
    xf = x.reshape(B, -1)
    F = xf.shape[1]
    itemsize = jnp.dtype(x.dtype).itemsize

    TB, TF = _choose_tiles(B, F, itemsize)
    grid = (pl.cdiv(B, TB), pl.cdiv(F, TF))

    cost = pl.CostEstimate(
        flops=B * F,                                      # one multiply / element
        transcendentals=0,
        bytes_accessed=(2 * B * F + B) * itemsize,
    )

    out = pl.pallas_call(
        _drop_path_kernel,
        out_shape=jax.ShapeDtypeStruct((B, F), x.dtype),
        grid=grid,
        in_specs=[
            pl.BlockSpec((TB, TF), lambda i, j: (i, j)),   # x tile
            pl.BlockSpec((TB, 1), lambda i, j: (i, 0)),    # per-sample mask
        ],
        out_specs=pl.BlockSpec((TB, TF), lambda i, j: (i, j)),
        compiler_params=pltpu.CompilerParams(
            dimension_semantics=("parallel", "parallel"),
            vmem_limit_bytes=_VMEM_LIMIT_BYTES),
        cost_estimate=cost,
        # Only donate when the caller no longer needs x (common inside a
        # residual block); avoids a second BxF HBM allocation.
        input_output_aliases=({0: 0} if donate_input else {}),
    )(xf, mask)

    return out.reshape(orig_shape)


class DropPath:
    """Drop paths (Stochastic Depth) per sample."""

    def __init__(self, drop_prob: float = 0.0, scale_by_keep: bool = True):
        self.drop_prob = drop_prob
        self.scale_by_keep = scale_by_keep
        self.training = True  # mimic nn.Module default .train() state

    def __call__(self, x, key):
        return drop_path(x, key, self.drop_prob, self.training, self.scale_by_keep)


if __name__ == "__main__":
    root = jax.random.PRNGKey(0)
    k_x, k_mask, k_x2, k_x3, k_mask3 = jax.random.split(root, 5)

    drop_prob = 0.25
    keep_prob = 1.0 - drop_prob
    module = DropPath(drop_prob=drop_prob, scale_by_keep=True)

    # ---- Case 1: small NCHW input, F = 4*16*16 = 1024 (lane-aligned). ----
    x = jax.random.normal(k_x, (2, 4, 16, 16), dtype=jnp.float32)
    y_train = jax.block_until_ready(module(x, k_mask))
    ref_mask = jax.random.bernoulli(k_mask, p=keep_prob, shape=(2,)).astype(jnp.float32)
    ref = x * (ref_mask / keep_prob).reshape(2, 1, 1, 1)
    assert jnp.allclose(y_train, ref, atol=1e-6), "training-path mismatch"

    # ---- Case 2: F = 3*5*7 = 105 < 128 -> full-extent lane block. ----
    x2 = jax.random.normal(k_x2, (2, 3, 5, 7), dtype=jnp.float32)
    y2 = jax.block_until_ready(module(x2, k_mask))
    ref2 = x2 * (ref_mask / keep_prob).reshape(2, 1, 1, 1)
    assert jnp.allclose(y2, ref2, atol=1e-6), "small-F path mismatch"

    # ---- Case 3: F = 3*10*10 = 300 (>128, not a multiple of 128) and B = 4
    # (not a multiple of 8) -> exercises cdiv-grid boundary masking with no
    # wrapper-side padding. ----
    x3 = jax.random.normal(k_x3, (4, 3, 10, 10), dtype=jnp.float32)
    y3 = jax.block_until_ready(module(x3, k_mask3))
    ref_mask3 = jax.random.bernoulli(k_mask3, p=keep_prob, shape=(4,)).astype(jnp.float32)
    ref3 = x3 * (ref_mask3 / keep_prob).reshape(4, 1, 1, 1)
    assert jnp.allclose(y3, ref3, atol=1e-6), "ragged-boundary path mismatch"

    # ---- Eval path: identity (drop_prob==0 or not training returns x). ----
    module.training = False
    y_eval = jax.block_until_ready(module(x, k_mask))
    assert jnp.array_equal(y_eval, x), "eval-path mismatch"

    print("KERNEL_OK")
</pallas_src>

<mosaic_0001>
module attributes {stable_mosaic.version = 11 : i64} {
  func.func @_drop_path_kernel(%arg0: i32, %arg1: i32, %arg2: memref<2x1024xf32, #tpu.memory_space<vmem>>, %arg3: memref<2x1xf32, #tpu.memory_space<vmem>>, %arg4: memref<2x1024xf32, #tpu.memory_space<vmem>>) attributes {dimension_semantics = [#tpu.dimension_semantics<parallel>, #tpu.dimension_semantics<parallel>], iteration_bounds = array<i64: 1, 1>, scalar_prefetch = 0 : i64, scratch_operands = 0 : i64, tpu.core_type = #tpu.core_type<tc>, window_params = [{transform_indices = @transform_0, window_bounds = array<i64: 2, 1024>}, {transform_indices = @transform_1, window_bounds = array<i64: 2, 1>}, {transform_indices = @transform_2, window_bounds = array<i64: 2, 1024>}]} {
    %c0 = arith.constant 0 : index
    %c0_0 = arith.constant 0 : index
    %0 = vector.load %arg2[%c0, %c0_0] : memref<2x1024xf32, #tpu.memory_space<vmem>>, vector<2x1024xf32>
    %c0_1 = arith.constant 0 : index
    %c0_2 = arith.constant 0 : index
    %1 = vector.load %arg3[%c0_1, %c0_2] : memref<2x1xf32, #tpu.memory_space<vmem>>, vector<2x1xf32>
    %2 = vector.broadcast %1 : vector<2x1xf32> to vector<2x1024xf32>
    %3 = arith.mulf %0, %2 : vector<2x1024xf32>
    %c0_3 = arith.constant 0 : index
    %c0_4 = arith.constant 0 : index
    %4 = vector.load %arg4[%c0_3, %c0_4] : memref<2x1024xf32, #tpu.memory_space<vmem>>, vector<2x1024xf32>
    tpu.vector_store %arg4[%c0_3, %c0_4], %3 {strides = array<i32>} : memref<2x1024xf32, #tpu.memory_space<vmem>>, vector<2x1024xf32>,
    return
  }
  func.func @transform_0(%arg0: i32, %arg1: i32) -> (i32, i32) {
    %c0_i32 = arith.constant 0 : i32
    return %arg0, %arg1 : i32, i32
  }
  func.func @transform_1(%arg0: i32, %arg1: i32) -> (i32, i32) {
    %c0_i32 = arith.constant 0 : i32
    %c0_i32_0 = arith.constant 0 : i32
    return %arg0, %c0_i32 : i32, i32
  }
  func.func @transform_2(%arg0: i32, %arg1: i32) -> (i32, i32) {
    %c0_i32 = arith.constant 0 : i32
    return %arg0, %arg1 : i32, i32
  }
}

</mosaic_0001>

<bundles_post_ra>
// kernel: tpu_custom_call.1
= control target key start
LH: loop header
LB: loop body
LE: loop exit
PB: predicated region body
PF: predicated region fallthrough
CT: control target
= control target key end

     0   :  { %7 = vsyncpa [#allocation3], 0  ;;  %s135_s0 = inlined_call_operand.hbm [shape: f32[2,1024], index: 0, kind: input, shape index: {}]   ;;  %s136_s1 = inlined_call_operand.vmem [shape: f32[2,1], index: 1, kind: input, shape index: {}]   ;;  %s137_s2 = inlined_call_operand.hbm [shape: f32[2,1024], index: 2, kind: output, shape index: {}]  }
   0x1   :  { %8 = vsyncpa [#allocation4], 0  ;;  %s107_s9 = smov [#allocation2]  }
   0x2   :  { %s15_s10 = sshll.u32 %s107_s9, 4  ;;  %s16_s10 = int_to_ptr.vmem [resolvable:$true] %s15_s10 }
   0x3   :  { %s71_s11 = scalar_lea.vmem %s16_s10, 256  ;;  %p76_p1 = scmp.lt.s32.totalorder %s16_s10, %s16_s10 }
   0x4   :  { %p72_p0 = scmp.ne.s32.totalorder %s16_s10, %s71_s11  ;;  %p77_p2 = scmp.lt.s32.totalorder %s71_s11, %s71_s11 }
   0x6   :  { %p78_p3 = por %p77_p2, %p76_p1 }
   0x8   :  { %p79_p4 = pnand %p78_p3, %p72_p0 }
   0xa   :  { %82 = shalt.err (!%p79_p4)
}
   0xb   :  { %18 = dma.hbm_to_vmem [thread:$0]  %s135_s0, 256, %s16_s10, [#allocation3]  }
   0xc   :  { %103 = dma.done.wait [#allocation3], 256  }
   0xd   :  { %104 = vsyncadd [#allocation3], 4294967040  ;;  %v108_v0 = vmov 0   ;;  %v26_v1 = vld [vmem:[%s136_s1] sm:$0x3]  ;;  %v34_v4 = vlaneseq  ;;  %v25_v10 = vld [vmem:[#allocation2 + $0x8] sm:$0xff] }
   0xe   :  { %62 = vset.pattern.permute.xlu0 %v108_v0  ;;  %v109_v2 = vmov 269488144   ;;  %v24_v9 = vld [vmem:[#allocation2] sm:$0xff]  ;;  %s110_s16 = smov [#allocation5]  }
   0xf   :  { %29 = vperm.xlu0 %62, %v26_v1   ;;  %v32_v3 = vunpack.c.l.s4 %v109_v2  ;;  %v35_v6 = vshrl.u32 %v34_v4, 7  ;;  %s49_s0 = sshll.u32 %s110_s16, 4  ;;  %s50_s0 = int_to_ptr.vmem [resolvable:$true] %s49_s0 }
  0x10   :  { %s83_s17 = scalar_lea.vmem %s50_s0, 256  ;;  %p88_p6 = scmp.lt.s32.totalorder %s50_s0, %s50_s0 }
  0x11   :  { %v33_v5 = vunpack.c.0.s8 %v32_v3  ;;  %p84_p5 = scmp.ne.s32.totalorder %s50_s0, %s83_s17  ;;  %p89_p7 = scmp.lt.s32.totalorder %s83_s17, %s83_s17 }
  0x13   :  { %v36_v7 = vsub.s32 %v33_v5, %v35_v6  ;;  %p90_p8 = por %p89_p7, %p88_p6 }
  0x15   :  { %p91_p9 = pnand %p90_p8, %p84_p5 }
  0x8a   :  { %v30_v8 = vpop.permute.xlu0 %29 }
  0x8b   :  { %v37_v11 = vrot.slane %v30_v8, %v36_v7 }
  0x8d   :  { %v39_v12 = vmul.f32 %v37_v11, %v24_v9  ;;  %v40_v13 = vmul.f32 %v37_v11, %v25_v10 }
  0x8f   :  { %41 = vst [vmem:[#allocation5] sm:$0xff] %v39_v12  ;;  %42 = vst [vmem:[#allocation5 + $0x8] sm:$0xff] %v40_v13 }
  0x90   :  { %94 = shalt.err (!%p91_p9)
}
  0x91   :  { %52 = dma.vmem_to_hbm [thread:$0]  %s50_s0, 256, %s137_s2, [#allocation4]  }
  0x92   :  { %105 = dma.done.wait [#allocation4], 256  }
  0x93   :  { %106 = vsyncadd [#allocation4], 4294967040 }
  0x94   :  { %56 = vsyncpa [#allocation3], 1 }
  0x95   :  { %57 = vsyncpa [#allocation4], 1 }

</bundles_post_ra>
